<compile_context>
chip_gen: v7x
topology: tpu7x:2x2x1
jax: 0.10.0
libtpu: 0.0.40
codegen_flags: <defaults>
</compile_context>

<pallas_src>
import math
import functools

import jax
import jax.numpy as jnp
from jax import lax
from jax.experimental import pallas as pl
from jax.experimental.pallas import tpu as pltpu


def get_fixed_sin_cos_encodings(d_model, max_len):
    """JAX port of the fixed sin/cos positional table (deterministic)."""
    assert d_model % 2 == 0
    position = jnp.arange(max_len, dtype=jnp.float32)[:, None]
    div_term = jnp.exp(
        jnp.arange(0, d_model, 2, dtype=jnp.float32) * (-math.log(10000.0) / d_model)
    )
    pe = jnp.zeros((max_len, d_model), dtype=jnp.float32)
    pe = pe.at[:, 0::2].set(jnp.sin(position * div_term))
    pe = pe.at[:, 1::2].set(jnp.cos(position * div_term))
    return pe


def _choose_tiles(length_q, length_k, d_model, itemsize,
                  target_bytes=4 << 20, min_steps=4):
    """Pick (block_q, lane_block) for the lane-dense (length_q, length_k*d_model) output.

    lane_block is a multiple of both 128 and d_model (or the full extent);
    block_q is a power-of-two multiple of 8 (or the full extent).  Tiles target
    ~4 MiB, and block sizes are shrunk until the grid has >= min_steps steps
    (when alignment allows) so both v7x TensorCores get pipelined work.
    """
    total_lanes = length_k * d_model
    unit = (128 // math.gcd(128, d_model)) * d_model   # lane granularity

    # --- lane block ---
    if total_lanes <= unit or total_lanes % unit != 0:
        lane_block = total_lanes                       # full extent (always legal)
    else:
        max_units = max(1, target_bytes // (8 * unit * itemsize))
        lane_block = min(total_lanes // unit, max_units) * unit

    # --- query block ---
    if length_q <= 8 or length_q % 8 != 0:
        block_q = length_q                             # full extent (always legal)
    else:
        rows = max(8, target_bytes // max(1, lane_block * itemsize))
        block_q = 8
        while block_q * 2 <= min(rows, length_q):
            block_q *= 2

    # --- guarantee enough grid steps for megacore + writeback pipelining ---
    def steps():
        return (-(-length_q // block_q)) * (-(-total_lanes // lane_block))

    while steps() < min_steps:
        if block_q > 8 and block_q % 16 == 0:
            block_q //= 2
        elif total_lanes % unit == 0 and lane_block > unit:
            lane_block = max(unit, (lane_block // unit) // 2 * unit)
        else:
            break

    return block_q, lane_block


def _rel_pos_kernel(table_ref, out_ref, *, block_q, lane_block, block_k,
                    d_model, d_shift, length_k, max_rel, n_sel, cross_attn):
    """One grid step fills a full-lane (block_q, block_k*d_model) output tile."""
    q0 = pl.program_id(0) * block_q
    k0 = pl.program_id(1) * block_k

    # lane l of the tile <-> (k = k0 + l // d_model, d = l % d_model)
    q_ids = q0 + lax.broadcasted_iota(jnp.int32, (block_q, lane_block), 0)
    lane = lax.broadcasted_iota(jnp.int32, (block_q, lane_block), 1)
    if d_shift is not None:
        k_ids = k0 + (lane >> d_shift)
    else:
        # TODO(synk): non-power-of-two d_model falls back to vector int division.
        k_ids = k0 + lane // d_model

    if cross_attn:
        # distance_mat[q, k] = (length_k - 1 - k) + q, clamped, no shift.
        dist = jnp.clip((length_k - 1 - k_ids) + q_ids, -max_rel, max_rel)
    else:
        # distance_mat[q, k] = k - q, clamped, shifted by +max_rel.
        dist = jnp.clip(k_ids - q_ids, -max_rel, max_rel) + max_rel
    # Reachable dist values are [0, n_sel); padded rows/lanes of partial blocks
    # may fall outside but are discarded by Pallas' partial-block handling.

    # Chained selects against the lane-tiled table rows: exact in any dtype
    # (pure select, no accumulation), no MXU, no lane-padded temporaries.
    result = jnp.broadcast_to(table_ref[0:1, :], (block_q, lane_block))
    for e in range(1, n_sel):
        result = jnp.where(dist == e, table_ref[e:e + 1, :], result)

    out_ref[...] = result.astype(out_ref.dtype)


def relative_positional_encoding(embeddings_table, length_q, length_k,
                                 max_relative_position, cross_attn=False):
    """Pallas equivalent of RelativePositionalEncoding.forward(length_q, length_k)."""
    num_emb, d_model = embeddings_table.shape
    itemsize = jnp.dtype(embeddings_table.dtype).itemsize
    total_lanes = length_k * d_model

    block_q, lane_block = _choose_tiles(length_q, length_k, d_model, itemsize)
    block_k = lane_block // d_model
    grid = (pl.cdiv(length_q, block_q), pl.cdiv(total_lanes, lane_block))

    # Only these indices are reachable after clipping (+shift for self-attn).
    n_sel = min(num_emb,
                (max_relative_position + 1) if cross_attn
                else (2 * max_relative_position + 1))

    # Lane-tiled table (num_emb, block_k*d_model): lane l holds table[:, l % d_model].
    # Tiny; built once outside the kernel and kept VMEM-resident (constant index_map).
    table_tiled = jnp.tile(embeddings_table, (1, block_k))

    d_shift = (d_model.bit_length() - 1) if (d_model & (d_model - 1)) == 0 else None

    kernel = functools.partial(
        _rel_pos_kernel, block_q=block_q, lane_block=lane_block, block_k=block_k,
        d_model=d_model, d_shift=d_shift, length_k=length_k,
        max_rel=max_relative_position, n_sel=n_sel, cross_attn=cross_attn)

    cost = pl.CostEstimate(
        flops=2 * n_sel * length_q * length_k * d_model,
        transcendentals=0,
        bytes_accessed=(length_q * total_lanes + num_emb * lane_block) * itemsize)

    out2d = pl.pallas_call(
        kernel,
        out_shape=jax.ShapeDtypeStruct((length_q, total_lanes),
                                       embeddings_table.dtype),
        grid=grid,
        in_specs=[
            # Full lane-tiled table, constant block index -> resident in VMEM.
            pl.BlockSpec((num_emb, lane_block), lambda i, j: (0, 0)),
        ],
        out_specs=pl.BlockSpec((block_q, lane_block), lambda i, j: (i, j)),
        compiler_params=pltpu.CompilerParams(
            dimension_semantics=("parallel", "parallel"),
            vmem_limit_bytes=48 * 1024 * 1024),
        cost_estimate=cost,
    )(table_tiled)

    # Contiguous (free) reshape back to the module's (length_q, length_k, d_model).
    return out2d.reshape(length_q, length_k, d_model)


def _reference_forward(table, length_q, length_k, max_rel, cross_attn=False):
    """Pure-JAX reference mirroring the PyTorch forward."""
    if cross_attn:
        dist = jnp.arange(length_k - 1, -1, -1)[None, :] + jnp.arange(length_q)[:, None]
    else:
        dist = jnp.arange(length_k)[None, :] - jnp.arange(length_q)[:, None]
    dist = jnp.clip(dist, -max_rel, max_rel)
    if not cross_attn:
        dist = dist + max_rel
    return table[dist]


if __name__ == "__main__":
    max_relative_position = 4
    d_model = 32
    length_q = 16
    length_k = 16

    key = jax.random.PRNGKey(0)
    k1, k2 = jax.random.split(key)

    # Case 1: trainable=False -> fixed sin/cos table, self-attention.
    num_emb_self = 2 * max_relative_position + 1
    fixed_table = get_fixed_sin_cos_encodings(d_model, num_emb_self)

    # Case 2: trainable=True -> nn.Embedding-like weight, self-attention (f32 + bf16).
    trainable_table = jax.random.normal(k1, (num_emb_self, d_model), dtype=jnp.float32)
    trainable_table_bf16 = trainable_table.astype(jnp.bfloat16)

    # Case 3: trainable=True, cross_attn=True -> (max_rel + 1) rows.
    num_emb_cross = max_relative_position + 1
    cross_table = jax.random.normal(k2, (num_emb_cross, d_model), dtype=jnp.float32)

    ok = True
    configs = [
        (fixed_table, False),
        (trainable_table, False),
        (trainable_table_bf16, False),
        (cross_table, True),
    ]
    for table, cross in configs:
        out = relative_positional_encoding(
            table, length_q, length_k, max_relative_position, cross_attn=cross)
        out = jax.block_until_ready(out)
        ref = _reference_forward(table, length_q, length_k,
                                 max_relative_position, cross_attn=cross)
        ok = ok and (out.shape == (length_q, length_k, d_model))
        ok = ok and bool(jnp.allclose(out.astype(jnp.float32),
                                      ref.astype(jnp.float32),
                                      atol=1e-5, rtol=1e-5))

    if ok:
        print("KERNEL_OK")
    else:
        print("KERNEL_MISMATCH")
</pallas_src>

<mosaic_0001>
module attributes {stable_mosaic.version = 11 : i64} {
  func.func @_rel_pos_kernel(%arg0: i32, %arg1: i32, %arg2: memref<9x256xf32, #tpu.memory_space<vmem>>, %arg3: memref<8x256xf32, #tpu.memory_space<vmem>>) attributes {dimension_semantics = [#tpu.dimension_semantics<parallel>, #tpu.dimension_semantics<parallel>], iteration_bounds = array<i64: 2, 2>, scalar_prefetch = 0 : i64, scratch_operands = 0 : i64, tpu.core_type = #tpu.core_type<tc>, window_params = [{pipeline_mode = #tpu.pipeline_mode<synchronous>, transform_indices = @transform_0, window_bounds = array<i64: 9, 256>}, {transform_indices = @transform_1, window_bounds = array<i64: 8, 256>}]} {
    %c8_i32 = arith.constant 8 : i32
    %0 = arith.muli %arg0, %c8_i32 : i32
    %c8_i32_0 = arith.constant 8 : i32
    %1 = arith.muli %arg1, %c8_i32_0 : i32
    %2 = tpu.iota {dimensions = array<i32: 0>} : vector<8x256xi32>
    %3 = vector.broadcast %0 : i32 to vector<8x256xi32>
    %4 = arith.addi %3, %2 : vector<8x256xi32>
    %5 = tpu.iota {dimensions = array<i32: 1>} : vector<8x256xi32>
    %c5_i32 = arith.constant 5 : i32
    %6 = vector.broadcast %c5_i32 : i32 to vector<8x256xi32>
    %7 = arith.shrsi %5, %6 : vector<8x256xi32>
    %8 = vector.broadcast %1 : i32 to vector<8x256xi32>
    %9 = arith.addi %8, %7 : vector<8x256xi32>
    %10 = arith.subi %9, %4 : vector<8x256xi32>
    %c-4_i32 = arith.constant -4 : i32
    %c4_i32 = arith.constant 4 : i32
    %11 = vector.broadcast %c-4_i32 : i32 to vector<8x256xi32>
    %12 = arith.maxsi %11, %10 : vector<8x256xi32>
    %13 = vector.broadcast %c4_i32 : i32 to vector<8x256xi32>
    %14 = arith.minsi %13, %12 : vector<8x256xi32>
    %c4_i32_1 = arith.constant 4 : i32
    %15 = vector.broadcast %c4_i32_1 : i32 to vector<8x256xi32>
    %16 = arith.addi %14, %15 : vector<8x256xi32>
    %c0 = arith.constant 0 : index
    %c0_2 = arith.constant 0 : index
    %17 = vector.load %arg2[%c0, %c0_2] : memref<9x256xf32, #tpu.memory_space<vmem>>, vector<1x256xf32>
    %18 = vector.shape_cast %17 : vector<1x256xf32> to vector<1x256xf32>
    %19 = vector.broadcast %18 : vector<1x256xf32> to vector<8x256xf32>
    %c1_i32 = arith.constant 1 : i32
    %20 = vector.broadcast %c1_i32 : i32 to vector<8x256xi32>
    %21 = arith.cmpi eq, %16, %20 : vector<8x256xi32>
    %c1 = arith.constant 1 : index
    %c0_3 = arith.constant 0 : index
    %22 = vector.load %arg2[%c1, %c0_3] : memref<9x256xf32, #tpu.memory_space<vmem>>, vector<1x256xf32>
    %23 = vector.shape_cast %22 : vector<1x256xf32> to vector<1x256xf32>
    %24 = vector.broadcast %23 : vector<1x256xf32> to vector<8x256xf32>
    %25 = arith.select %21, %24, %19 : vector<8x256xi1>, vector<8x256xf32>
    %c2_i32 = arith.constant 2 : i32
    %26 = vector.broadcast %c2_i32 : i32 to vector<8x256xi32>
    %27 = arith.cmpi eq, %16, %26 : vector<8x256xi32>
    %c2 = arith.constant 2 : index
    %c0_4 = arith.constant 0 : index
    %28 = vector.load %arg2[%c2, %c0_4] : memref<9x256xf32, #tpu.memory_space<vmem>>, vector<1x256xf32>
    %29 = vector.shape_cast %28 : vector<1x256xf32> to vector<1x256xf32>
    %30 = vector.broadcast %29 : vector<1x256xf32> to vector<8x256xf32>
    %31 = arith.select %27, %30, %25 : vector<8x256xi1>, vector<8x256xf32>
    %c3_i32 = arith.constant 3 : i32
    %32 = vector.broadcast %c3_i32 : i32 to vector<8x256xi32>
    %33 = arith.cmpi eq, %16, %32 : vector<8x256xi32>
    %c3 = arith.constant 3 : index
    %c0_5 = arith.constant 0 : index
    %34 = vector.load %arg2[%c3, %c0_5] : memref<9x256xf32, #tpu.memory_space<vmem>>, vector<1x256xf32>
    %35 = vector.shape_cast %34 : vector<1x256xf32> to vector<1x256xf32>
    %36 = vector.broadcast %35 : vector<1x256xf32> to vector<8x256xf32>
    %37 = arith.select %33, %36, %31 : vector<8x256xi1>, vector<8x256xf32>
    %c4_i32_6 = arith.constant 4 : i32
    %38 = vector.broadcast %c4_i32_6 : i32 to vector<8x256xi32>
    %39 = arith.cmpi eq, %16, %38 : vector<8x256xi32>
    %c4 = arith.constant 4 : index
    %c0_7 = arith.constant 0 : index
    %40 = vector.load %arg2[%c4, %c0_7] : memref<9x256xf32, #tpu.memory_space<vmem>>, vector<1x256xf32>
    %41 = vector.shape_cast %40 : vector<1x256xf32> to vector<1x256xf32>
    %42 = vector.broadcast %41 : vector<1x256xf32> to vector<8x256xf32>
    %43 = arith.select %39, %42, %37 : vector<8x256xi1>, vector<8x256xf32>
    %c5_i32_8 = arith.constant 5 : i32
    %44 = vector.broadcast %c5_i32_8 : i32 to vector<8x256xi32>
    %45 = arith.cmpi eq, %16, %44 : vector<8x256xi32>
    %c5 = arith.constant 5 : index
    %c0_9 = arith.constant 0 : index
    %46 = vector.load %arg2[%c5, %c0_9] : memref<9x256xf32, #tpu.memory_space<vmem>>, vector<1x256xf32>
    %47 = vector.shape_cast %46 : vector<1x256xf32> to vector<1x256xf32>
    %48 = vector.broadcast %47 : vector<1x256xf32> to vector<8x256xf32>
    %49 = arith.select %45, %48, %43 : vector<8x256xi1>, vector<8x256xf32>
    %c6_i32 = arith.constant 6 : i32
    %50 = vector.broadcast %c6_i32 : i32 to vector<8x256xi32>
    %51 = arith.cmpi eq, %16, %50 : vector<8x256xi32>
    %c6 = arith.constant 6 : index
    %c0_10 = arith.constant 0 : index
    %52 = vector.load %arg2[%c6, %c0_10] : memref<9x256xf32, #tpu.memory_space<vmem>>, vector<1x256xf32>
    %53 = vector.shape_cast %52 : vector<1x256xf32> to vector<1x256xf32>
    %54 = vector.broadcast %53 : vector<1x256xf32> to vector<8x256xf32>
    %55 = arith.select %51, %54, %49 : vector<8x256xi1>, vector<8x256xf32>
    %c7_i32 = arith.constant 7 : i32
    %56 = vector.broadcast %c7_i32 : i32 to vector<8x256xi32>
    %57 = arith.cmpi eq, %16, %56 : vector<8x256xi32>
    %c7 = arith.constant 7 : index
    %c0_11 = arith.constant 0 : index
    %58 = vector.load %arg2[%c7, %c0_11] : memref<9x256xf32, #tpu.memory_space<vmem>>, vector<1x256xf32>
    %59 = vector.shape_cast %58 : vector<1x256xf32> to vector<1x256xf32>
    %60 = vector.broadcast %59 : vector<1x256xf32> to vector<8x256xf32>
    %61 = arith.select %57, %60, %55 : vector<8x256xi1>, vector<8x256xf32>
    %c8_i32_12 = arith.constant 8 : i32
    %62 = vector.broadcast %c8_i32_12 : i32 to vector<8x256xi32>
    %63 = arith.cmpi eq, %16, %62 : vector<8x256xi32>
    %c8 = arith.constant 8 : index
    %c0_13 = arith.constant 0 : index
    %64 = vector.load %arg2[%c8, %c0_13] : memref<9x256xf32, #tpu.memory_space<vmem>>, vector<1x256xf32>
    %65 = vector.shape_cast %64 : vector<1x256xf32> to vector<1x256xf32>
    %66 = vector.broadcast %65 : vector<1x256xf32> to vector<8x256xf32>
    %67 = arith.select %63, %66, %61 : vector<8x256xi1>, vector<8x256xf32>
    %c0_14 = arith.constant 0 : index
    %c0_15 = arith.constant 0 : index
    %68 = vector.load %arg3[%c0_14, %c0_15] : memref<8x256xf32, #tpu.memory_space<vmem>>, vector<8x256xf32>
    tpu.vector_store %arg3[%c0_14, %c0_15], %67 {strides = array<i32>} : memref<8x256xf32, #tpu.memory_space<vmem>>, vector<8x256xf32>,
    return
  }
  func.func @transform_0(%arg0: i32, %arg1: i32) -> (i32, i32) {
    %c0_i32 = arith.constant 0 : i32
    %c0_i32_0 = arith.constant 0 : i32
    %c0_i32_1 = arith.constant 0 : i32
    return %c0_i32, %c0_i32_0 : i32, i32
  }
  func.func @transform_1(%arg0: i32, %arg1: i32) -> (i32, i32) {
    %c0_i32 = arith.constant 0 : i32
    return %arg0, %arg1 : i32, i32
  }
}

</mosaic_0001>

<bundles_post_ra>
// kernel: tpu_custom_call.1
= control target key start
LH: loop header
LB: loop body
LE: loop exit
PB: predicated region body
PF: predicated region fallthrough
CT: control target
= control target key end

     0   :  { %6 = vsyncpa [#allocation3], 0  ;;  %s843_s0 = inlined_call_operand.hbm [shape: f32[9,256], index: 0, kind: input, shape index: {}]   ;;  %s844_s1 = inlined_call_operand.hbm [shape: f32[16,512], index: 1, kind: output, shape index: {}]  }
   0x1   :  { %7 = vsyncpa [#allocation4], 0 }
   0x2   :  { %9 = vsyncpa [#allocation4 + $0x1], 0  ;;  %s632_s6 = smov 0   ;;  %s634_s7 = smov 0  }
   0x3   :  { %s636_s8 = smov 0   ;;  %s638_s9 = smov 0  }
   0x4   :  { %s640_s10 = smov 0   ;;  %s642_s11 = smov 0  }
   0x5   :  { %s644_s12 = smov 0   ;;  %s646_s13 = smov 0  }
   0x6 LB: > { %s391_s14 = sadd.s32 4294967295, %s616_s13   ;;  %s392_s15 = sadd.s32 4294967294, %s616_s13   ;;  %s616_s13 = sphi %s646_s13, %s15_s13   ;;  %s612_s12 = sphi %s644_s12, %s864_s12   ;;  %s608_s11 = sphi %s642_s11, %s863_s11   ;;  %s604_s10 = sphi %s640_s10, %s862_s10   ;;  %s600_s9 = sphi %s638_s9, %s861_s9   ;;  %s596_s8 = sphi %s636_s8, %s860_s8   ;;  %s592_s7 = sphi %s634_s7, %s859_s7   ;;  %s588_s6 = sphi %s632_s6, %s858_s6  }
   0x7   : > { %s24_s16 = sadd.s32 1, %s608_s11  ;;  %s27_s17 = sadd.s32 1, %s612_s12 }
   0x8   : > { %p25_p0 = scmp.ge.s32.totalorder %s24_s16, 2  ;;  %s57_s18 = sadd.s32 1, %s596_s8 }
   0x9   : > { %p67_p1 = scmp.ne.s32.totalorder %s596_s8, %s592_s7  ;;  %p68_p2 = scmp.eq.s32.totalorder %s391_s14, 3 }
   0xa   : > { %s866_s16 = smov (%p25_p0, %s24_s16), 0  ;;  %s868_s17 = smov (!%p25_p0, %s27_s17), %s612_s12 }
   0xb   : > { %s53_s19 = ssub.s32 %s608_s11, %s866_s16  ;;  %p684_p3 = por %p68_p2, %p67_p1 }
   0xc   : > { %p29_p4 = scmp.ge.s32.totalorder %s868_s17, 2  ;;  %p73_p5 = scmp.ne.s32.totalorder %s592_s7, %s588_s6 }
   0xd   : > { %s849_s20 = scalar_select %p684_p3, 1, 0 }
   0xe   : > { %p74_p6 = scmp.eq.s32.totalorder %s392_s15, 3  ;;  %p393_p7 = scmp.ge.s32.totalorder %s616_s13, 1 }
   0xf   : > { %s870_s17 = smov (%p29_p4, %s868_s17), 0  ;;  %p81_p9 = scmp.lt.s32.totalorder %s616_s13, 5 }
  0x10   : > { %p693_p8 = por %p74_p6, %p73_p5  ;;  %s52_s22 = ssub.s32 %s612_s12, %s870_s17 }
  0x11   : > { %s54_s23 = sor.u32 %s53_s19, %s52_s22  ;;  %p700_p10 = pnand %p393_p7, %p81_p9 }
  0x12   : > { %s850_s21 = scalar_select %p693_p8, 1, 0 }
  0x13   : > { %s851_s24 = scalar_select %p700_p10, 1, 0 }
  0x14   : > { %p55_p11 = scmp.eq.s32.totalorder %s54_s23, 0  ;;  %p704_p12 = scmp.eq.s32.totalorder %s391_s14, 0 }
  0x15   : > { %p412_p13 = pneg %p700_p10  ;;  %s618_s27 = smov [#allocation2]  }
  0x16   : > { %s852_s25 = scalar_select %p704_p12, 1, 0 }
  0x17   : > { %s711_s26 = scalar_select %p55_p11, %s596_s8, %s57_s18  }
  0x18   : > { %s93_s28 = sshll.u32 %s618_s27, 4  ;;  %p715_p0 = pnand %p704_p12, %p412_p13  ;;  %s94_s28 = int_to_ptr.vmem [resolvable:$true] %s93_s28 }
  0x19   : > { %s490_s3 = scalar_lea.hbm %s843_s0, 512 }
  0x1a   : > { %p491_p1 = scmp.ne.s32.totalorder %s843_s0, %s490_s3  ;;  %p492_p2 = pneg %p715_p0 }
  0x1b   : > { %p497_p6 = scmp.lt.u32.totalorder %s490_s3, %s843_s0 }
  0x1c   : > { %p493_p4 = pnand %p492_p2, %p491_p1 }
  0x1e   : > { %p494_p5 = pneg %p493_p4 }
  0x20   : > { %p499_p7 = pnand %p497_p6, %p494_p5 }
  0x22   : > { %502 = shalt.err (!%p499_p7)
}
  0x23   : > { %s503_s18 = scalar_lea.vmem %s94_s28, 512  ;;  %p511_p8 = scmp.lt.s32.totalorder %s94_s28, %s94_s28 }
  0x24   : > { %p504_p9 = scmp.ne.s32.totalorder %s94_s28, %s503_s18  ;;  %p512_p3 = scmp.lt.s32.totalorder %s503_s18, %s503_s18 }
  0x26   : > { %p506_p11 = pnand %p504_p9, %p492_p2  ;;  %p513_p12 = por %p512_p3, %p511_p8 }
  0x28   : > { %p507_p13 = pneg %p506_p11 }
  0x2a   : > { %p514_p10 = pnand %p513_p12, %p507_p13 }
  0x2c   : > { %517 = shalt.err (!%p514_p10)
}
  0x2d   : > { %s619_s19 = smov 256   ;;  %s620_s22 = smov 16  }
  0x2e   : > { %415 = dma.hbm_to_vmem [thread:$0]  (!%p715_p0), %s843_s0, 512, %s94_s28, [#allocation3], %s619_s19, %s619_s19, %s620_s22  }
  0x2f   : > { %p854_p1 = scmp.ne.s32.totalorder %s851_s24, 0 }
  0x30   : > { %p855_p4 = scmp.ne.s32.totalorder (!%p854_p1), %s852_s25, 0 }
  0x31   : > { %109 = sbr.rel (%p854_p1) target bundleno = 99 (0x63), region = 24 }
  0x38   : > { %579 = dma.done.wait (%p855_p4), [#allocation3], 512  }
  0x39   : > { %581 = vsyncadd (%p855_p4), [#allocation3], 4294966784  ;;  %s398_s30 = sshll.u32 %s604_s10, 3  ;;  %v127_v0 = vlaneseq  ;;  %s399_s2 = sshll.u32 %s600_s9, 3 }
  0x3a   : > { %v129_v1 = vstv %s398_s30  ;;  %v136_v4 = vstv %s399_s2  ;;  %v151_v13 = vld [vmem:[#allocation2] ss:$8 sm:$0x3]  ;;  %v166_v14 = vld [vmem:[#allocation2 + $0x1] ss:$8 sm:$0x3] }
  0x3b   : > { %v128_v2 = vshrl.u32 %v127_v0, 7  ;;  %v132_v3 = vand.u32 127, %v127_v0  ;;  %v183_v16 = vld [vmem:[#allocation2 + $0x2] ss:$8 sm:$0x3]  ;;  %s121_s24 = sand.u32 1, %s592_s7  }
  0x3c   : > { %v200_v17 = vld [vmem:[#allocation2 + $0x3] ss:$8 sm:$0x3]  ;;  %v747_v18 = vld [vmem:[#allocation2 + $0x4] ss:$8 sm:$0x3] }
  0x3d   : > { %v130_v5 = vadd.s32 %v129_v1, %v128_v2  ;;  %v134_v6 = vshra.s32 %v132_v3, 5  ;;  %v133_v7 = vadd.s32 128, %v132_v3  ;;  %v743_v10 = vsub.s32 0, %v128_v2  ;;  %v750_v22 = vld [vmem:[#allocation2 + $0x5] ss:$8 sm:$0x3] }
  0x3e   : > { %v745_v11 = vsub.s32 1, %v128_v2  ;;  %v754_v25 = vld [vmem:[#allocation2 + $0x6] ss:$8 sm:$0x3]  ;;  %s770_s25 = sshll.u32 %s121_s24, 4  ;;  %s401_s28 = sshll.u32 %s600_s9, 1 }
  0x3f   : > { %v137_v8 = vadd.s32 %v136_v4, %v134_v6  ;;  %v135_v9 = vshra.s32 %v133_v7, 5  ;;  %v156_v21 = vrot.slane %v151_v13, %v743_v10  ;;  %v171_v23 = vrot.slane %v166_v14, %v743_v10  ;;  %v268_v32 = vld [vmem:[#allocation2 + $0x7] ss:$8 sm:$0x3]  ;;  %s402_s29 = sshll.u32 %s604_s10, 2  ;;  %s123_s9 = scalar_lea.vmem [#allocation5], %s770_s25 }
  0x40   : > { %v188_v24 = vrot.slane %v183_v16, %v743_v10  ;;  %v205_v27 = vrot.slane %v200_v17, %v743_v10  ;;  %v160_v29 = vrot.slane %v151_v13, %v745_v11  ;;  %v222_v31 = vrot.slane %v747_v18, %v743_v10  ;;  %v285_v36 = vld [vmem:[#allocation2 + $0x10] ss:$8 sm:$0x3]  ;;  %s314_s3 = sadd.s32 %s402_s29, %s401_s28  ;;  %s318_s10 = sshll.u32 %s123_s9, 4  ;;  %s785_s10 = int_to_ptr.vmem [resolvable:$true] %s318_s10 }
  0x41   : > { %v139_v12 = vsub.s32 %v137_v8, %v130_v5  ;;  %v138_v15 = vadd.s32 %v136_v4, %v135_v9  ;;  %v175_v33 = vrot.slane %v166_v14, %v745_v11  ;;  %v239_v34 = vrot.slane %v750_v22, %v743_v10  ;;  %s403_s4 = sshll.u32 %s314_s3, 7  ;;  %s302_s18 = scalar_lea.sflag [#allocation4], %s121_s24 }
  0x42   : > { %v256_v35 = vrot.slane %v754_v25, %v743_v10  ;;  %v192_v38 = vrot.slane %v183_v16, %v745_v11  ;;  %v209_v39 = vrot.slane %v200_v17, %v745_v11  ;;  %v273_v41 = vrot.slane %v268_v32, %v743_v10  ;;  %s790_s15 = scalar_lea.hbm %s844_s1, %s403_s4  ;;  %s518_s19 = scalar_lea.vmem %s785_s10, 256 }
  0x43   : > { %vm141_vm0 = vcmp.gt.s32.totalorder %v139_v12, 4294967292  ;;  %v140_v19 = vsub.s32 %v138_v15, %v130_v5  ;;  %v226_v42 = vrot.slane %v747_v18, %v745_v11  ;;  %v290_v44 = vrot.slane %v285_v36, %v743_v10  ;;  %p519_p3 = scmp.ne.s32.totalorder %s785_s10, %s518_s19  ;;  %p856_p8 = scmp.ne.s32.totalorder %s849_s20, 0 }
  0x44   : > { %v142_v20 = vsel %vm141_vm0, %v139_v12, 4294967292  ;;  %v243_v47 = vrot.slane %v750_v22, %v745_v11  ;;  %v260_v53 = vrot.slane %v754_v25, %v745_v11  ;;  %v277_v56 = vrot.slane %v268_v32, %v745_v11  ;;  %s621_s22 = smov [#allocation5]  }
  0x45   : > { %vm145_vm1 = vcmp.lt.s32.totalorder %v142_v20, 4  ;;  %vm143_vm2 = vcmp.gt.s32.totalorder %v140_v19, 4294967292  ;;  %v294_v59 = vrot.slane %v285_v36, %v745_v11  ;;  %p520_p10 = pnand %p519_p3, %p856_p8  ;;  %s522_s23 = sshll.u32 %s621_s22, 4  ;;  %s523_s23 = int_to_ptr.vmem [resolvable:$false] %s522_s23 }
  0x46   : > { %v146_v26 = vsel %vm145_vm1, %v142_v20, 4  ;;  %v144_v28 = vsel %vm143_vm2, %v140_v19, 4294967292  ;;  %s524_s27 = scalar_lea.vmem %s523_s23, 512  ;;  %p525_p0 = scmp.lt.s32.totalorder %s785_s10, %s523_s23 }
  0x47   : > { %v149_v30 = vadd.s32 4, %v146_v26  ;;  %vm147_vm3 = vcmp.lt.s32.totalorder %v144_v28, 4  ;;  %p521_p12 = pneg %p520_p10  ;;  %p526_p2 = scmp.lt.s32.totalorder %s524_s27, %s518_s19 }
  0x48   : > { %v148_v37 = vsel %vm147_vm3, %v144_v28, 4 }
  0x49   : > { %vm163_vm4 = vcmp.eq.s32.totalorder %v149_v30, 1  ;;  %vm180_vm5 = vcmp.eq.s32.totalorder %v149_v30, 2  ;;  %vm197_vm6 = vcmp.eq.s32.totalorder %v149_v30, 3  ;;  %vm214_vm7 = vcmp.eq.s32.totalorder %v149_v30, 4  ;;  %p527_p5 = por %p526_p2, %p525_p0 }
  0x4a   : > { %v178_v40 = vsel %vm163_vm4, %v171_v23, %v156_v21  ;;  %vm231_vm8 = vcmp.eq.s32.totalorder %v149_v30, 5  ;;  %v150_v45 = vadd.s32 4, %v148_v37  ;;  %vm248_vm9 = vcmp.eq.s32.totalorder %v149_v30, 6 }
  0x4b   : > { %v195_v43 = vsel %vm180_vm5, %v188_v24, %v178_v40  ;;  %vm265_vm10 = vcmp.eq.s32.totalorder %v149_v30, 7  ;;  %vm282_vm14 = vcmp.eq.s32.totalorder %v149_v30, 8  ;;  %p528_p6 = pnand %p527_p5, %p521_p12 }
  0x4c   : > { %v212_v46 = vsel %vm197_vm6, %v205_v27, %v195_v43  ;;  %vm164_vm11 = vcmp.eq.s32.totalorder %v150_v45, 1  ;;  %vm181_vm12 = vcmp.eq.s32.totalorder %v150_v45, 2  ;;  %vm198_vm13 = vcmp.eq.s32.totalorder %v150_v45, 3 }
  0x4d   : > { %v229_v48 = vsel %vm214_vm7, %v222_v31, %v212_v46  ;;  %v179_v50 = vsel %vm164_vm11, %v175_v33, %v160_v29  ;;  %vm215_vm15 = vcmp.eq.s32.totalorder %v150_v45, 4  ;;  %vm232_vm0 = vcmp.eq.s32.totalorder %v150_v45, 5 }
  0x4e   : > { %v246_v49 = vsel %vm231_vm8, %v239_v34, %v229_v48  ;;  %v196_v52 = vsel %vm181_vm12, %v192_v38, %v179_v50  ;;  %vm249_vm1 = vcmp.eq.s32.totalorder %v150_v45, 6  ;;  %vm266_vm2 = vcmp.eq.s32.totalorder %v150_v45, 7 }
  0x4f   : > { %v263_v51 = vsel %vm248_vm9, %v256_v35, %v246_v49  ;;  %v213_v55 = vsel %vm198_vm13, %v209_v39, %v196_v52  ;;  %vm283_vm3 = vcmp.eq.s32.totalorder %v150_v45, 8 }
  0x50   : > { %v280_v54 = vsel %vm265_vm10, %v273_v41, %v263_v51  ;;  %v230_v58 = vsel %vm215_vm15, %v226_v42, %v213_v55 }
  0x51   : > { %v297_v57 = vsel %vm282_vm14, %v290_v44, %v280_v54  ;;  %v247_v60 = vsel %vm232_vm0, %v243_v47, %v230_v58 }
  0x52   : > { %299 = vst [vmem:[%s123_s9] sm:$0xff] %v297_v57  ;;  %v264_v61 = vsel %vm249_vm1, %v260_v53, %v247_v60 }
  0x53   : > { %v281_v62 = vsel %vm266_vm2, %v277_v56, %v264_v61 }
  0x54   : > { %v298_v63 = vsel %vm283_vm3, %v294_v59, %v281_v62 }
  0x55   : > { %300 = vst [vmem:[%s123_s9 + $0x8] sm:$0xff] %v298_v63 }
  0x56   : > { %531 = shalt.err (!%p528_p6)
}
  0x57   : > { %s532_s30 = scalar_lea.hbm %s790_s15, 256  ;;  %s536_s25 = scalar_lea.hbm %s844_s1, 1024 }
  0x58   : > { %p533_p7 = scmp.ne.s32.totalorder %s790_s15, %s532_s30  ;;  %p537_p13 = scmp.lt.u32.totalorder %s790_s15, %s844_s1 }
  0x59   : > { %p538_p1 = scmp.lt.u32.totalorder %s536_s25, %s532_s30  ;;  %p540_p3 = scmp.lt.u32.totalorder %s532_s30, %s790_s15 }
  0x5a   : > { %p534_p9 = pnand %p533_p7, %p856_p8 }
  0x5b   : > { %p539_p4 = por %p538_p1, %p537_p13 }
  0x5c   : > { %p535_p11 = pneg %p534_p9 }
  0x5d   : > { %p541_p10 = por %p540_p3, %p539_p4 }
  0x5f   : > { %p542_p12 = pnand %p541_p10, %p535_p11 }
  0x61   : > { %545 = shalt.err (!%p542_p12)
}
  0x62   : > { %410 = dma.vmem_to_hbm [thread:$0]  (%p856_p8), %s785_s10, 256, %s790_s15, %s302_s18  }
  0x63 PF: > { %p422_p0 = scmp.ge.s32.totalorder %s616_s13, 2  ;;  %s330_s3 = sand.u32 1, %s588_s6  }
  0x64   : > { %p857_p2 = scmp.ne.s32.totalorder %s850_s21, 0  ;;  %s331_s9 = scalar_lea.sflag [#allocation4], %s330_s3 }
  0x66   : > { %p417_p5 = pnand %p422_p0, %p857_p2 }
  0x68   : > { %583 = dma.done.wait (!%p417_p5), %s331_s9, 256  }
  0x69   : > { %585 = vsyncadd (!%p417_p5), %s331_s9, 4294967040  ;;  %s15_s13 = sadd.s32 1, %s616_s13   ;;  %s858_s6 = smov %s592_s7 }
  0x6a   : > { %p12_p6 = scmp.ge.s32.totalorder %s15_s13, 6   ;;  %s859_s7 = smov %s596_s8 }
  0x6b   : > { %s860_s8 = smov %s711_s26  ;;  %s861_s9 = smov %s608_s11 }
  0x6c   : > { %s862_s10 = smov %s612_s12  ;;  %s863_s11 = smov %s866_s16 }
  0x6d   : > { %s864_s12 = smov %s870_s17  ;;  %14 = sbr.rel (!%p12_p6) target bundleno = 6 (0x6), region = 69 }
  0x74   :  { %336 = vsyncpa [#allocation3], 1 }
  0x75   :  { %338 = vsyncpa [#allocation3 + $0x1], 1 }
  0x76   :  { %339 = vsyncpa [#allocation4], 1 }
  0x77   :  { %341 = vsyncpa [#allocation4 + $0x1], 1 }

</bundles_post_ra>
